<compile_context>
chip_gen: v7x
topology: tpu7x:2x2x1
jax: 0.10.0
libtpu: 0.0.40
codegen_flags: <defaults>
</compile_context>

<pallas_src>
import jax
import jax.numpy as jnp
from jax.experimental import pallas as pl
from jax.experimental.pallas import tpu as pltpu


def _round_up(a: int, b: int) -> int:
    return (a + b - 1) // b * b


def _cdiv(a: int, b: int) -> int:
    return -(-a // b)


def _vmem_budget_bytes():
    """Generation-aware (budget_for_tiling, vmem_limit_request) in bytes."""
    cap = None
    try:
        info = pltpu.get_tpu_info()
        cap = int(getattr(info, "vmem_capacity_bytes", 0)) or None
    except Exception:
        cap = None
    if cap is None:
        cap = 64 * 1024 * 1024  # conservative default = v7x per-TC physical VMEM
    budget = (cap * 3) // 4     # 48 MiB on v7x, 96 MiB on v5e/v6e
    limit = (cap * 7) // 8      # 56 MiB on v7x, 112 MiB on v5e/v6e (headroom kept)
    return budget, limit


def _m_align(M: int) -> int:
    if M >= 128:
        return 128
    if M >= 16:
        return 16
    return 8


def _choose_tm(M: int, K: int, N_pad: int, x_itemsize: int, out_itemsize: int,
               budget_bytes: int):
    """Largest M tile (<=1024) whose pipeline footprint fits the VMEM budget.
    Counts the DEFAULT 2x buffering of every BlockSpec (including the constant-index
    weight/bias). Returns None if even the smallest tile doesn't fit (-> K-tiled path)."""
    align = _m_align(M)
    resident = 2 * (K * N_pad * 2) + 2 * (N_pad * 4)   # W^T bf16 + bias f32, 2x buffered

    def cost(tm):
        return (resident
                + 2 * tm * K * x_itemsize              # double-buffered x tile
                + 2 * tm * N_pad * out_itemsize)       # double-buffered output tile

    tm = min(1024, _round_up(M, align))
    while tm > align and cost(tm) > budget_bytes:
        tm = max(align, (tm // 2) // align * align)
    if cost(tm) > budget_bytes:
        return None
    # Ensure >=2 grid steps when possible so the "parallel" M axis can shard across
    # v7x's two TensorCores (harmless on single-TC v5e/v6e).
    if _cdiv(M, tm) < 2 and M > align:
        tm = max(align, _round_up(_cdiv(M, 2), align))
    return tm


def _flatten_head_kernel(x_ref, w_ref, b_ref, o_ref):
    # x arrives in its original dtype (no wrapper copy); cast to bf16 on the VPU
    # (free — the kernel is DMA-bound), matmul on the MXU with f32 accumulation,
    # bias broadcast over rows, store lane-dense output.
    x = x_ref[...].astype(jnp.bfloat16)
    acc = jnp.dot(x, w_ref[...], preferred_element_type=jnp.float32)
    o_ref[...] = (acc + b_ref[...]).astype(o_ref.dtype)


def _flatten_head_kernel_ktiled(x_ref, w_ref, b_ref, o_ref, acc_ref):
    # Fallback path: K is a grid axis, f32 accumulator in VMEM (P3 pattern).
    @pl.when(pl.program_id(1) == 0)
    def _():
        acc_ref[...] = jnp.zeros_like(acc_ref)

    acc_ref[...] += jnp.dot(x_ref[...].astype(jnp.bfloat16), w_ref[...],
                            preferred_element_type=jnp.float32)

    @pl.when(pl.program_id(1) == pl.num_programs(1) - 1)
    def _():
        o_ref[...] = (acc_ref[...] + b_ref[...]).astype(o_ref.dtype)


def _ktiled_path(x_flat, w_t, b_p, M, K, N_pad, x_itemsize, out_itemsize,
                 budget, vmem_limit, out_dtype):
    align = _m_align(M)
    tm = min(512, _round_up(M, align))
    tk = 2048

    def cost(tm_, tk_):
        return (2 * tm_ * tk_ * x_itemsize     # x tile
                + 2 * tk_ * N_pad * 2          # W^T tile (bf16)
                + 2 * tm_ * N_pad * out_itemsize
                + tm_ * N_pad * 4              # accumulator scratch
                + 2 * N_pad * 4)               # bias

    while cost(tm, tk) > budget and tk > 128:
        tk //= 2
    while cost(tm, tk) > budget and tm > align:
        tm = max(align, (tm // 2) // align * align)

    # Zero-pad K (both operands) so every reduction block is exact.
    K_pad = _round_up(K, tk)
    if K_pad != K:
        x_flat = jnp.zeros((M, K_pad), x_flat.dtype).at[:, :K].set(x_flat)
        w_t = jnp.zeros((K_pad, N_pad), w_t.dtype).at[:K, :].set(w_t)

    return pl.pallas_call(
        _flatten_head_kernel_ktiled,
        out_shape=jax.ShapeDtypeStruct((M, N_pad), out_dtype),
        grid_spec=pltpu.PrefetchScalarGridSpec(
            num_scalar_prefetch=0,
            grid=(_cdiv(M, tm), K_pad // tk),
            in_specs=[
                pl.BlockSpec((tm, tk), lambda i, k: (i, k)),
                pl.BlockSpec((tk, N_pad), lambda i, k: (k, 0)),
                pl.BlockSpec((1, N_pad), lambda i, k: (0, 0)),
            ],
            out_specs=pl.BlockSpec((tm, N_pad), lambda i, k: (i, 0)),
            scratch_shapes=[pltpu.VMEM((tm, N_pad), jnp.float32)],
        ),
        compiler_params=pltpu.CompilerParams(
            dimension_semantics=("parallel", "arbitrary"),
            vmem_limit_bytes=int(vmem_limit),
        ),
    )(x_flat, w_t, b_p)


def flatten_head_forward(x, weight, bias):
    """x: [B, n_vars, d_model, patch_num]; weight: [target_window, nf] (nn.Linear layout);
    bias: [target_window]. Returns [B, n_vars, target_window]."""
    B, n_vars, d_model, patch_num = x.shape
    nf = d_model * patch_num
    target_window = weight.shape[0]
    assert weight.shape == (target_window, nf)
    assert bias.shape == (target_window,)

    M, K, N = B * n_vars, nf, target_window
    N_pad = _round_up(N, 128)

    # Flatten(start_dim=-2) + fold leading dims: contiguous reshape, no data movement.
    x_flat = x.reshape(M, K)
    x_itemsize = jnp.dtype(x_flat.dtype).itemsize
    out_dtype = x.dtype
    out_itemsize = jnp.dtype(out_dtype).itemsize

    # Tiny parameters: cast to bf16, pad the lane dim only when needed.
    w_t = weight.T.astype(jnp.bfloat16)                      # (K, N)
    b_p = bias.astype(jnp.float32).reshape(1, N)             # (1, N)
    if N_pad != N:
        w_t = jnp.zeros((K, N_pad), jnp.bfloat16).at[:, :N].set(w_t)
        b_p = jnp.zeros((1, N_pad), jnp.float32).at[:, :N].set(b_p)

    budget, vmem_limit = _vmem_budget_bytes()
    tm = _choose_tm(M, K, N_pad, x_itemsize, out_itemsize, budget)

    if tm is not None:
        # Weight-resident path: K is NOT a grid axis; W^T stays in VMEM across all
        # M tiles (constant index_map), x streamed once, lane-dense output store.
        out = pl.pallas_call(
            _flatten_head_kernel,
            out_shape=jax.ShapeDtypeStruct((M, N_pad), out_dtype),
            grid_spec=pltpu.PrefetchScalarGridSpec(
                num_scalar_prefetch=0,
                grid=(_cdiv(M, tm),),
                in_specs=[
                    pl.BlockSpec((tm, K), lambda i: (i, 0)),       # x tile (streamed)
                    pl.BlockSpec((K, N_pad), lambda i: (0, 0)),    # W^T (VMEM-resident)
                    pl.BlockSpec((1, N_pad), lambda i: (0, 0)),    # bias (resident)
                ],
                out_specs=pl.BlockSpec((tm, N_pad), lambda i: (i, 0)),
            ),
            compiler_params=pltpu.CompilerParams(
                dimension_semantics=("parallel",),
                vmem_limit_bytes=int(vmem_limit),
            ),
        )(x_flat, w_t, b_p)
    else:
        # Weight too large for resident VMEM on this generation -> K-tiled accumulator path.
        out = _ktiled_path(x_flat, w_t, b_p, M, K, N_pad, x_itemsize, out_itemsize,
                           budget, vmem_limit, out_dtype)

    if N_pad != N:
        out = out[:, :N]

    # Dropout with p=0 (and eval mode) is identity.
    # TODO(synk): no training-mode dropout RNG implemented (head_dropout defaults to 0).
    return out.reshape(B, n_vars, N)


if __name__ == "__main__":
    # Small shapes consistent with the module: B=2, n_vars=4, d_model=16, patch_num=8
    # -> nf = 128, target_window = 32.
    B, n_vars, d_model, patch_num = 2, 4, 16, 8
    nf = d_model * patch_num
    target_window = 32

    key = jax.random.PRNGKey(0)
    kx, kw, kb = jax.random.split(key, 3)

    x = jax.random.normal(kx, (B, n_vars, d_model, patch_num), dtype=jnp.float32)
    # nn.Linear-shaped parameters: weight [out, in], bias [out].
    bound = 1.0 / (nf ** 0.5)
    weight = jax.random.uniform(kw, (target_window, nf), jnp.float32, -bound, bound)
    bias = jax.random.uniform(kb, (target_window,), jnp.float32, -bound, bound)

    out = flatten_head_forward(x, weight, bias)
    out = jax.block_until_ready(out)

    # Reference in plain JAX (f32). The kernel casts operands to bf16 (f32 accumulation),
    # so use a correspondingly looser tolerance.
    ref = x.reshape(B, n_vars, nf) @ weight.T + bias
    assert out.shape == (B, n_vars, target_window)
    assert jnp.allclose(out, ref, atol=2e-2, rtol=2e-2)

    print("KERNEL_OK")
</pallas_src>

<mosaic_0001>
module attributes {stable_mosaic.version = 11 : i64} {
  func.func @_flatten_head_kernel(%arg0: i32, %arg1: memref<8x128xf32, #tpu.memory_space<vmem>>, %arg2: memref<128x128xbf16, #tpu.memory_space<vmem>>, %arg3: memref<1x128xf32, #tpu.memory_space<vmem>>, %arg4: memref<8x128xf32, #tpu.memory_space<vmem>>) attributes {dimension_semantics = [#tpu.dimension_semantics<parallel>], iteration_bounds = array<i64: 1>, scalar_prefetch = 0 : i64, scratch_operands = 0 : i64, tpu.core_type = #tpu.core_type<tc>, window_params = [{transform_indices = @transform_0, window_bounds = array<i64: 8, 128>}, {pipeline_mode = #tpu.pipeline_mode<synchronous>, transform_indices = @transform_1, window_bounds = array<i64: 128, 128>}, {pipeline_mode = #tpu.pipeline_mode<synchronous>, transform_indices = @transform_2, window_bounds = array<i64: 1, 128>}, {transform_indices = @transform_3, window_bounds = array<i64: 8, 128>}]} {
    %c0 = arith.constant 0 : index
    %c0_0 = arith.constant 0 : index
    %0 = vector.load %arg1[%c0, %c0_0] : memref<8x128xf32, #tpu.memory_space<vmem>>, vector<8x128xf32>
    %1 = arith.truncf %0 : vector<8x128xf32> to vector<8x128xbf16>
    %c0_1 = arith.constant 0 : index
    %c0_2 = arith.constant 0 : index
    %2 = vector.load %arg2[%c0_1, %c0_2] : memref<128x128xbf16, #tpu.memory_space<vmem>>, vector<128x128xbf16>
    %cst = arith.constant dense<0.000000e+00> : vector<8x128xf32>
    %3 = tpu.matmul %1, %2, %cst {dimension_numbers = #tpu.dot_dimension_numbers<[1], [0], [0], [1], [0, 0, 1, 1], [], []>} : vector<8x128xbf16>, vector<128x128xbf16>, vector<8x128xf32> -> vector<8x128xf32>
    %c0_3 = arith.constant 0 : index
    %c0_4 = arith.constant 0 : index
    %4 = vector.load %arg3[%c0_3, %c0_4] : memref<1x128xf32, #tpu.memory_space<vmem>>, vector<1x128xf32>
    %5 = vector.broadcast %4 : vector<1x128xf32> to vector<8x128xf32>
    %6 = arith.addf %3, %5 : vector<8x128xf32>
    %c0_5 = arith.constant 0 : index
    %c0_6 = arith.constant 0 : index
    %7 = vector.load %arg4[%c0_5, %c0_6] : memref<8x128xf32, #tpu.memory_space<vmem>>, vector<8x128xf32>
    tpu.vector_store %arg4[%c0_5, %c0_6], %6 {strides = array<i32>} : memref<8x128xf32, #tpu.memory_space<vmem>>, vector<8x128xf32>,
    return
  }
  func.func @transform_0(%arg0: i32) -> (i32, i32) {
    %c0_i32 = arith.constant 0 : i32
    %c0_i32_0 = arith.constant 0 : i32
    return %arg0, %c0_i32 : i32, i32
  }
  func.func @transform_1(%arg0: i32) -> (i32, i32) {
    %c0_i32 = arith.constant 0 : i32
    %c0_i32_0 = arith.constant 0 : i32
    %c0_i32_1 = arith.constant 0 : i32
    return %c0_i32, %c0_i32_0 : i32, i32
  }
  func.func @transform_2(%arg0: i32) -> (i32, i32) {
    %c0_i32 = arith.constant 0 : i32
    %c0_i32_0 = arith.constant 0 : i32
    %c0_i32_1 = arith.constant 0 : i32
    return %c0_i32, %c0_i32_0 : i32, i32
  }
  func.func @transform_3(%arg0: i32) -> (i32, i32) {
    %c0_i32 = arith.constant 0 : i32
    %c0_i32_0 = arith.constant 0 : i32
    return %arg0, %c0_i32 : i32, i32
  }
}

</mosaic_0001>

<bundles_post_ra>
// kernel: tpu_custom_call.1
= control target key start
LH: loop header
LB: loop body
LE: loop exit
PB: predicated region body
PF: predicated region fallthrough
CT: control target
= control target key end

     0   :  { %8 = vsyncpa [#allocation3], 0  ;;  %s370_s0 = inlined_call_operand.hbm [shape: f32[8,128], index: 0, kind: input, shape index: {}]   ;;  %s371_s1 = inlined_call_operand.hbm [shape: bf16[128,128], index: 1, kind: input, shape index: {}]   ;;  %s372_s2 = inlined_call_operand.vmem [shape: f32[1,128], index: 2, kind: input, shape index: {}]   ;;  %s373_s3 = inlined_call_operand.hbm [shape: f32[8,128], index: 3, kind: output, shape index: {}]  }
   0x1   :  { %9 = vsyncpa [#allocation6], 0 }
   0x2   :  { %10 = vsyncpa [#allocation4], 0  ;;  %s297_s12 = smov [#allocation2]   ;;  %s298_s14 = smov [#allocation5]  }
   0x3   :  { %s17_s13 = sshll.u32 %s297_s12, 4  ;;  %s26_s15 = sshll.u32 %s298_s14, 4  ;;  %s18_s13 = int_to_ptr.vmem [resolvable:$true] %s17_s13  ;;  %s324_s15 = int_to_ptr.vmem [resolvable:$true] %s26_s15 }
   0x4   :  { %s225_s18 = scalar_lea.hbm %s370_s0, 128 }
   0x5   :  { %p226_p0 = scmp.ne.s32.totalorder %s370_s0, %s225_s18  ;;  %p229_p1 = scmp.lt.u32.totalorder %s225_s18, %s370_s0 }
   0x7   :  { %p231_p2 = pnand %p229_p1, %p226_p0 }
   0x9   :  { %234 = shalt.err (!%p231_p2)
}
   0xa   :  { %s235_s23 = scalar_lea.vmem %s18_s13, 128  ;;  %p240_p4 = scmp.lt.s32.totalorder %s18_s13, %s18_s13 }
   0xb   :  { %p236_p3 = scmp.ne.s32.totalorder %s18_s13, %s235_s23  ;;  %p241_p5 = scmp.lt.s32.totalorder %s235_s23, %s235_s23 }
   0xd   :  { %p242_p6 = por %p241_p5, %p240_p4 }
   0xf   :  { %p243_p7 = pnand %p242_p6, %p236_p3 }
  0x11   :  { %246 = shalt.err (!%p243_p7)
}
  0x12   :  { %20 = dma.hbm_to_vmem [thread:$0]  %s370_s0, 128, %s18_s13, [#allocation3]  }
  0x13   :  { %s247_s28 = scalar_lea.hbm %s371_s1, 1024 }
  0x14   :  { %p248_p8 = scmp.ne.s32.totalorder %s371_s1, %s247_s28  ;;  %p251_p9 = scmp.lt.u32.totalorder %s247_s28, %s371_s1 }
  0x16   :  { %p253_p10 = pnand %p251_p9, %p248_p8 }
  0x18   :  { %256 = shalt.err (!%p253_p10)
}
  0x19   :  { %s257_s6 = scalar_lea.vmem %s324_s15, 1024  ;;  %p262_p12 = scmp.lt.s32.totalorder %s324_s15, %s324_s15 }
  0x1a   :  { %p258_p11 = scmp.ne.s32.totalorder %s324_s15, %s257_s6  ;;  %p263_p13 = scmp.lt.s32.totalorder %s257_s6, %s257_s6 }
  0x1c   :  { %p264_p0 = por %p263_p13, %p262_p12 }
  0x1e   :  { %p265_p1 = pnand %p264_p0, %p258_p11 }
  0x20   :  { %268 = shalt.err (!%p265_p1)
}
  0x21   :  { %s299_s0 = smov 64   ;;  %s300_s7 = smov 4  }
  0x22   :  { %32 = dma.hbm_to_vmem [thread:$0]  %s371_s1, 1024, %s324_s15, [#allocation6], %s299_s0, %s299_s0, %s300_s7  }
  0x23   :  { %291 = dma.done.wait [#allocation3], 128  }
  0x24   :  { %292 = vsyncadd [#allocation3], 4294967168 }
  0x25   :  { %293 = dma.done.wait [#allocation6], 1024  }
  0x26   :  { %294 = vsyncadd [#allocation6], 4294966272  ;;  %v301_v0 = vmov 0.0   ;;  %vm302_vm0 = vmmov 0   ;;  %v217_v1 = vld [vmem:[#allocation5] sm:$0xff]   ;;  %v218_v2 = vld [vmem:[#allocation5 + $0x8] sm:$0xff]  }
  0x27   :  { %190 = vmatprep.subr.bf16.mxu0 %v301_v0  ;;  %206 = vmatprep.mubr.msk.bf16.mxu0 %vm302_vm0, %v301_v0  ;;  %v219_v3 = vld [vmem:[#allocation5 + $0x10] sm:$0xff]   ;;  %v220_v4 = vld [vmem:[#allocation5 + $0x18] sm:$0xff]   ;;  %v221_v5 = vld [vmem:[#allocation5 + $0x20] sm:$0xff]   ;;  %s303_s11 = smov [#allocation7]  }
  0x28   :  { %191 = vmatpush3.bf16.msra.mxu0 %v217_v1  ;;  %v222_v6 = vld [vmem:[#allocation5 + $0x28] sm:$0xff]   ;;  %v223_v7 = vld [vmem:[#allocation5 + $0x30] sm:$0xff]   ;;  %v224_v8 = vld [vmem:[#allocation5 + $0x38] sm:$0xff]   ;;  %s162_s12 = sshll.u32 %s303_s11, 4  ;;  %s163_s12 = int_to_ptr.vmem [resolvable:$true] %s162_s12 }
  0x29   :  { %192 = vmatprep.subr.bf16.mxu0 %v301_v0  ;;  %v42_v9 = vld [vmem:[#allocation2] sm:$0xff]  ;;  %s269_s13 = scalar_lea.vmem %s163_s12, 128  ;;  %p274_p3 = scmp.lt.s32.totalorder %s163_s12, %s163_s12 }
  0x2a   :  { %v43_v10 = vpack.c.bf16 %v42_v9, %v42_v9  ;;  %v172_v11 = vld [vmem:[%s372_s2] ss:$0 sm:$0xff]  ;;  %p270_p2 = scmp.ne.s32.totalorder %s163_s12, %s269_s13  ;;  %p275_p4 = scmp.lt.s32.totalorder %s269_s13, %s269_s13 }
  0x2c   :  { %193 = vmatpush3.bf16.msra.mxu0 %v218_v2  ;;  %p276_p5 = por %p275_p4, %p274_p3 }
  0x2d   :  { %194 = vmatprep.subr.bf16.mxu0 %v301_v0 }
  0x2e   :  { %p277_p6 = pnand %p276_p5, %p270_p2 }
  0x30   :  { %195 = vmatpush3.bf16.msra.mxu0 %v219_v3 }
  0x31   :  { %196 = vmatprep.subr.bf16.mxu0 %v301_v0 }
  0x34   :  { %197 = vmatpush3.bf16.msra.mxu0 %v220_v4 }
  0x35   :  { %198 = vmatprep.subr.bf16.mxu0 %v301_v0 }
  0x38   :  { %199 = vmatpush3.bf16.msra.mxu0 %v221_v5 }
  0x39   :  { %200 = vmatprep.subr.bf16.mxu0 %v301_v0 }
  0x3c   :  { %201 = vmatpush3.bf16.msra.mxu0 %v222_v6 }
  0x3d   :  { %202 = vmatprep.subr.bf16.mxu0 %v301_v0 }
  0x40   :  { %203 = vmatpush3.bf16.msra.mxu0 %v223_v7 }
  0x41   :  { %204 = vmatprep.subr.bf16.mxu0 %v301_v0 }
  0x44   :  { %205 = vmatpush3.bf16.msra.mxu0 %v224_v8 }
  0x47   :  { %207 = vmatmul.mubr.bf16.vlgmr.msra.gmra.mrb[0].mxu0 %v43_v10 }
 0x11a   :  { %v149_v12 = vpop.f32.mrb[0].mxu0 }
 0x11b   :  { %v150_v13 = vadd.f32 %v172_v11, %v149_v12  ;;  %v208_v14 = vpop.f32.mrb[1].mxu0 }
 0x11c   :  { %v152_v15 = vpop.f32.mrb[2].mxu0 }
 0x11d   :  { %155 = vst [vmem:[#allocation7] sm:$0xff] %v150_v13  ;;  %v209_v16 = vpop.f32.mrb[3].mxu0 }
 0x11e   :  { %280 = shalt.err (!%p277_p6)
}
 0x11f   :  { %s281_s2 = scalar_lea.hbm %s373_s3, 128 }
 0x120   :  { %p282_p7 = scmp.ne.s32.totalorder %s373_s3, %s281_s2  ;;  %p285_p8 = scmp.lt.u32.totalorder %s281_s2, %s373_s3 }
 0x122   :  { %p287_p9 = pnand %p285_p8, %p282_p7 }
 0x124   :  { %290 = shalt.err (!%p287_p9)
}
 0x125   :  { %165 = dma.vmem_to_hbm [thread:$0]  %s163_s12, 128, %s373_s3, [#allocation4]  }
 0x126   :  { %295 = dma.done.wait [#allocation4], 128  }
 0x127   :  { %296 = vsyncadd [#allocation4], 4294967168 }
 0x128   :  { %169 = vsyncpa [#allocation3], 1 }
 0x129   :  { %170 = vsyncpa [#allocation6], 1 }
 0x12a   :  { %171 = vsyncpa [#allocation4], 1 }

</bundles_post_ra>
